<compile_context>
chip_gen: v7x
topology: tpu7x:2x2x1
jax: 0.10.0
libtpu: 0.0.40
codegen_flags: <defaults>
</compile_context>

<pallas_src>
import numpy as np
import jax
import jax.numpy as jnp
from jax.experimental import pallas as pl
from jax.experimental.pallas import tpu as pltpu

NUM_CORNERS = 8


def _joint_metric_kernel(gt_ref, pc_ref, pp_ref, out_ref):
    f32 = jnp.float32
    gt = gt_ref[...].astype(f32)      # (B, 24)  flattened gt_box; row 1 lives in cols 12..23
    pc = pc_ref[...].astype(f32)      # (B, 3)   pred center
    pp = pp_ref[...].astype(f32)      # (B, 24)  pred corners, corner-major xyz
    B = gt.shape[0]

    # ---- gt box fields as (B, 1) columns (gt_box[:, 1, k] == gt[:, 12 + k]) ----
    def g(k):
        return gt[:, 12 + k:13 + k]

    cx, cy, cz = g(0), g(1), g(2)
    hx, hy, hz = 0.5 * g(3), 0.5 * g(4), 0.5 * g(5)
    rxx, rxy, rxz = g(6), g(7), g(8)
    ryx, ryy, ryz = g(9), g(10), g(11)

    # ---- center errors (means over B*3 elements) ----
    dc = gt[:, 12:15] - pc                                   # (B, 3)
    inv_nc = 1.0 / (3.0 * B)
    l1 = jnp.sum(jnp.abs(dc)) * inv_nc
    l2 = jnp.sum(dc * dc) * inv_nc

    # ---- normalize rx, ry (rsqrt -> EUP slot, free alongside VPU work) ----
    inv_rx = jax.lax.rsqrt(rxx * rxx + rxy * rxy + rxz * rxz)
    rxx, rxy, rxz = rxx * inv_rx, rxy * inv_rx, rxz * inv_rx
    inv_ry = jax.lax.rsqrt(ryx * ryx + ryy * ryy + ryz * ryz)
    ryx, ryy, ryz = ryx * inv_ry, ryy * inv_ry, ryz * inv_ry

    # rz = cross(rx, ry), component-wise
    rzx = rxy * ryz - rxz * ryy
    rzy = rxz * ryx - rxx * ryz
    rzz = rxx * ryy - rxy * ryx

    # ---- corner signs generated in-kernel: (1, 8), corner index on lanes ----
    c = jax.lax.broadcasted_iota(jnp.int32, (1, NUM_CORNERS), 1)
    sx = jnp.where((c & 4) != 0, 1.0, -1.0).astype(f32)
    sy = jnp.where((c & 2) != 0, 1.0, -1.0).astype(f32)
    sz = jnp.where((c & 1) != 0, 1.0, -1.0).astype(f32)

    # gt box corners, per coordinate: (B, 8), gt-corner index on lanes
    gx = cx + sx * (hx * rxx) + sy * (hy * ryx) + sz * (hz * rzx)
    gy = cy + sx * (hx * rxy) + sy * (hy * ryy) + sz * (hz * rzy)
    gz = cz + sx * (hx * rxz) + sy * (hy * ryz) + sz * (hz * rzz)

    # ---- chamfer: unroll the 8 pred corners; everything stays 2-D / in-vreg ----
    dist1 = None       # per gt corner: nearest pred corner, (B, 8)
    dist2_sum = None   # running sum over pred corners of nearest-gt distance, (B, 1)
    for j in range(NUM_CORNERS):
        pxj = pp[:, 3 * j + 0:3 * j + 1]                     # (B, 1)
        pyj = pp[:, 3 * j + 1:3 * j + 2]
        pzj = pp[:, 3 * j + 2:3 * j + 3]
        dj = (gx - pxj) ** 2 + (gy - pyj) ** 2 + (gz - pzj) ** 2   # (B, 8)
        dist1 = dj if dist1 is None else jnp.minimum(dist1, dj)
        d2j = jnp.min(dj, axis=1, keepdims=True)             # (B, 1) lane-min (XLU)
        dist2_sum = d2j if dist2_sum is None else dist2_sum + d2j

    cd = (jnp.sum(dist1) + jnp.sum(dist2_sum)) / float(NUM_CORNERS * B)

    # ---- single lane-dense output: l1, l2, cd in lanes 0..2 of one (1, 128) row ----
    lane = jax.lax.broadcasted_iota(jnp.int32, (1, 128), 1)
    out_ref[...] = (jnp.where(lane == 0, l1, 0.0)
                    + jnp.where(lane == 1, l2, 0.0)
                    + jnp.where(lane == 2, cd, 0.0)).astype(out_ref.dtype)


def joint_net_metric(preds, labels):
    """Pallas implementation of JointNetMetric.forward (mode='train')."""
    gt_box_full = labels['gt_box']                     # (B, 2, 12)
    B = gt_box_full.shape[0]
    gt2d = gt_box_full.reshape(B, 24)                  # free metadata reshape (contiguous)
    pc = preds['center']                               # (B, 3)
    pp2d = preds['pts'].reshape(B, 3 * NUM_CORNERS)    # free metadata reshape (contiguous)

    vm = pl.BlockSpec(memory_space=pltpu.MemorySpace.VMEM)
    out = pl.pallas_call(
        _joint_metric_kernel,
        out_shape=jax.ShapeDtypeStruct((1, 128), jnp.float32),
        in_specs=[vm, vm, vm],
        out_specs=vm,
    )(gt2d, pc, pp2d)

    return {'me-l1center': out[0, 0],
            'me-l2center': out[0, 1],
            'me-cd': out[0, 2]}


def _reference(preds, labels):
    """Pure-JAX reference of the same forward pass (for correctness check)."""
    gt_box = labels['gt_box'][:, 1, :]
    center, size = gt_box[:, :3], gt_box[:, 3:6]
    rx, ry = gt_box[:, 6:9], gt_box[:, 9:12]
    l1 = jnp.mean(jnp.abs(center - preds['center']))
    l2 = jnp.mean((center - preds['center']) ** 2)
    rx = rx / jnp.sqrt(jnp.sum(rx * rx, -1, keepdims=True))
    ry = ry / jnp.sqrt(jnp.sum(ry * ry, -1, keepdims=True))
    rz = jnp.cross(rx, ry)
    signs = jnp.asarray(
        [[sx, sy, sz] for sx in (-1.0, 1.0) for sy in (-1.0, 1.0)
         for sz in (-1.0, 1.0)], dtype=jnp.float32)
    R = jnp.stack([rx, ry, rz], axis=1)                              # (B, 3, 3)
    gt_pts = center[:, None, :] + jnp.einsum('pc,bc,bcd->bpd', signs,
                                             0.5 * size, R)
    pp = preds['pts']
    d = jnp.sum((gt_pts[:, :, None, :] - pp[:, None, :, :]) ** 2, -1)
    cd = jnp.mean(jnp.min(d, 2) + jnp.min(d, 1))
    return l1, l2, cd


if __name__ == "__main__":
    B = 2
    key = jax.random.PRNGKey(0)
    k1, k2, k3 = jax.random.split(key, 3)

    # labels['gt_box']: (B, 2, 12) -> row index 1 is used; 12 = center/size/rx/ry
    labels = {'gt_box': jax.random.normal(k1, (B, 2, 12), jnp.float32)}
    preds = {
        'center': jax.random.normal(k2, (B, 3), jnp.float32),
        'pts': jax.random.normal(k3, (B, NUM_CORNERS, 3), jnp.float32),
    }

    metrics = joint_net_metric(preds, labels)
    jax.block_until_ready(metrics)

    ref_l1, ref_l2, ref_cd = _reference(preds, labels)
    np.testing.assert_allclose(np.asarray(metrics['me-l1center']),
                               np.asarray(ref_l1), rtol=1e-4, atol=1e-5)
    np.testing.assert_allclose(np.asarray(metrics['me-l2center']),
                               np.asarray(ref_l2), rtol=1e-4, atol=1e-5)
    np.testing.assert_allclose(np.asarray(metrics['me-cd']),
                               np.asarray(ref_cd), rtol=1e-4, atol=1e-5)

    print("KERNEL_OK")
</pallas_src>

<mosaic_0001>
module attributes {stable_mosaic.version = 11 : i64} {
  func.func @_joint_metric_kernel(%arg0: memref<2x24xf32, #tpu.memory_space<vmem>>, %arg1: memref<2x3xf32, #tpu.memory_space<vmem>>, %arg2: memref<2x24xf32, #tpu.memory_space<vmem>>, %arg3: memref<1x128xf32, #tpu.memory_space<vmem>>) attributes {dimension_semantics = [], scalar_prefetch = 0 : i64, scratch_operands = 0 : i64, tpu.core_type = #tpu.core_type<tc>} {
    %c0 = arith.constant 0 : index
    %c0_0 = arith.constant 0 : index
    %0 = vector.load %arg0[%c0, %c0_0] : memref<2x24xf32, #tpu.memory_space<vmem>>, vector<2x24xf32>
    %c0_1 = arith.constant 0 : index
    %c0_2 = arith.constant 0 : index
    %1 = vector.load %arg1[%c0_1, %c0_2] : memref<2x3xf32, #tpu.memory_space<vmem>>, vector<2x3xf32>
    %c0_3 = arith.constant 0 : index
    %c0_4 = arith.constant 0 : index
    %2 = vector.load %arg2[%c0_3, %c0_4] : memref<2x24xf32, #tpu.memory_space<vmem>>, vector<2x24xf32>
    %3 = vector.extract_strided_slice %0 {offsets = [0, 12], sizes = [2, 1], strides = [1, 1]} : vector<2x24xf32> to vector<2x1xf32>
    %4 = vector.extract_strided_slice %0 {offsets = [0, 13], sizes = [2, 1], strides = [1, 1]} : vector<2x24xf32> to vector<2x1xf32>
    %5 = vector.extract_strided_slice %0 {offsets = [0, 14], sizes = [2, 1], strides = [1, 1]} : vector<2x24xf32> to vector<2x1xf32>
    %6 = vector.extract_strided_slice %0 {offsets = [0, 15], sizes = [2, 1], strides = [1, 1]} : vector<2x24xf32> to vector<2x1xf32>
    %cst = arith.constant 5.000000e-01 : f32
    %7 = vector.broadcast %cst : f32 to vector<2x1xf32>
    %8 = arith.mulf %7, %6 : vector<2x1xf32>
    %9 = vector.extract_strided_slice %0 {offsets = [0, 16], sizes = [2, 1], strides = [1, 1]} : vector<2x24xf32> to vector<2x1xf32>
    %cst_5 = arith.constant 5.000000e-01 : f32
    %10 = vector.broadcast %cst_5 : f32 to vector<2x1xf32>
    %11 = arith.mulf %10, %9 : vector<2x1xf32>
    %12 = vector.extract_strided_slice %0 {offsets = [0, 17], sizes = [2, 1], strides = [1, 1]} : vector<2x24xf32> to vector<2x1xf32>
    %cst_6 = arith.constant 5.000000e-01 : f32
    %13 = vector.broadcast %cst_6 : f32 to vector<2x1xf32>
    %14 = arith.mulf %13, %12 : vector<2x1xf32>
    %15 = vector.extract_strided_slice %0 {offsets = [0, 18], sizes = [2, 1], strides = [1, 1]} : vector<2x24xf32> to vector<2x1xf32>
    %16 = vector.extract_strided_slice %0 {offsets = [0, 19], sizes = [2, 1], strides = [1, 1]} : vector<2x24xf32> to vector<2x1xf32>
    %17 = vector.extract_strided_slice %0 {offsets = [0, 20], sizes = [2, 1], strides = [1, 1]} : vector<2x24xf32> to vector<2x1xf32>
    %18 = vector.extract_strided_slice %0 {offsets = [0, 21], sizes = [2, 1], strides = [1, 1]} : vector<2x24xf32> to vector<2x1xf32>
    %19 = vector.extract_strided_slice %0 {offsets = [0, 22], sizes = [2, 1], strides = [1, 1]} : vector<2x24xf32> to vector<2x1xf32>
    %20 = vector.extract_strided_slice %0 {offsets = [0, 23], sizes = [2, 1], strides = [1, 1]} : vector<2x24xf32> to vector<2x1xf32>
    %21 = vector.extract_strided_slice %0 {offsets = [0, 12], sizes = [2, 3], strides = [1, 1]} : vector<2x24xf32> to vector<2x3xf32>
    %22 = arith.subf %21, %1 : vector<2x3xf32>
    %23 = math.absf %22 : vector<2x3xf32>
    %24 = vector.shape_cast %23 : vector<2x3xf32> to vector<1x2x3xf32>
    %cst_7 = arith.constant dense<0.000000e+00> : vector<1xf32>
    %25 = vector.multi_reduction <add>, %24, %cst_7 [1, 2] : vector<1x2x3xf32> to vector<1xf32>
    %26 = vector.shape_cast %25 : vector<1xf32> to vector<1x1x1xf32>
    %27 = vector.extract %26[0, 0, 0] : f32 from vector<1x1x1xf32>
    %cst_8 = arith.constant 0.166666672 : f32
    %28 = arith.mulf %27, %cst_8 : f32
    %29 = arith.mulf %22, %22 : vector<2x3xf32>
    %30 = vector.shape_cast %29 : vector<2x3xf32> to vector<1x2x3xf32>
    %cst_9 = arith.constant dense<0.000000e+00> : vector<1xf32>
    %31 = vector.multi_reduction <add>, %30, %cst_9 [1, 2] : vector<1x2x3xf32> to vector<1xf32>
    %32 = vector.shape_cast %31 : vector<1xf32> to vector<1x1x1xf32>
    %33 = vector.extract %32[0, 0, 0] : f32 from vector<1x1x1xf32>
    %cst_10 = arith.constant 0.166666672 : f32
    %34 = arith.mulf %33, %cst_10 : f32
    %35 = arith.mulf %15, %15 : vector<2x1xf32>
    %36 = arith.mulf %16, %16 : vector<2x1xf32>
    %37 = arith.addf %35, %36 : vector<2x1xf32>
    %38 = arith.mulf %17, %17 : vector<2x1xf32>
    %39 = arith.addf %37, %38 : vector<2x1xf32>
    %40 = math.rsqrt %39 : vector<2x1xf32>
    %41 = arith.mulf %15, %40 : vector<2x1xf32>
    %42 = arith.mulf %16, %40 : vector<2x1xf32>
    %43 = arith.mulf %17, %40 : vector<2x1xf32>
    %44 = arith.mulf %18, %18 : vector<2x1xf32>
    %45 = arith.mulf %19, %19 : vector<2x1xf32>
    %46 = arith.addf %44, %45 : vector<2x1xf32>
    %47 = arith.mulf %20, %20 : vector<2x1xf32>
    %48 = arith.addf %46, %47 : vector<2x1xf32>
    %49 = math.rsqrt %48 : vector<2x1xf32>
    %50 = arith.mulf %18, %49 : vector<2x1xf32>
    %51 = arith.mulf %19, %49 : vector<2x1xf32>
    %52 = arith.mulf %20, %49 : vector<2x1xf32>
    %53 = arith.mulf %42, %52 : vector<2x1xf32>
    %54 = arith.mulf %43, %51 : vector<2x1xf32>
    %55 = arith.subf %53, %54 : vector<2x1xf32>
    %56 = arith.mulf %43, %50 : vector<2x1xf32>
    %57 = arith.mulf %41, %52 : vector<2x1xf32>
    %58 = arith.subf %56, %57 : vector<2x1xf32>
    %59 = arith.mulf %41, %51 : vector<2x1xf32>
    %60 = arith.mulf %42, %50 : vector<2x1xf32>
    %61 = arith.subf %59, %60 : vector<2x1xf32>
    %62 = tpu.iota {dimensions = array<i32: 1>} : vector<1x8xi32>
    %c4_i32 = arith.constant 4 : i32
    %63 = vector.broadcast %c4_i32 : i32 to vector<1x8xi32>
    %64 = arith.andi %62, %63 : vector<1x8xi32>
    %c0_i32 = arith.constant 0 : i32
    %65 = vector.broadcast %c0_i32 : i32 to vector<1x8xi32>
    %66 = arith.cmpi ne, %64, %65 : vector<1x8xi32>
    %cst_11 = arith.constant 1.000000e+00 : f32
    %cst_12 = arith.constant -1.000000e+00 : f32
    %67 = vector.broadcast %cst_11 : f32 to vector<1x8xf32>
    %68 = vector.broadcast %cst_12 : f32 to vector<1x8xf32>
    %69 = arith.select %66, %67, %68 : vector<1x8xi1>, vector<1x8xf32>
    %c2_i32 = arith.constant 2 : i32
    %70 = vector.broadcast %c2_i32 : i32 to vector<1x8xi32>
    %71 = arith.andi %62, %70 : vector<1x8xi32>
    %c0_i32_13 = arith.constant 0 : i32
    %72 = vector.broadcast %c0_i32_13 : i32 to vector<1x8xi32>
    %73 = arith.cmpi ne, %71, %72 : vector<1x8xi32>
    %cst_14 = arith.constant 1.000000e+00 : f32
    %cst_15 = arith.constant -1.000000e+00 : f32
    %74 = vector.broadcast %cst_14 : f32 to vector<1x8xf32>
    %75 = vector.broadcast %cst_15 : f32 to vector<1x8xf32>
    %76 = arith.select %73, %74, %75 : vector<1x8xi1>, vector<1x8xf32>
    %c1_i32 = arith.constant 1 : i32
    %77 = vector.broadcast %c1_i32 : i32 to vector<1x8xi32>
    %78 = arith.andi %62, %77 : vector<1x8xi32>
    %c0_i32_16 = arith.constant 0 : i32
    %79 = vector.broadcast %c0_i32_16 : i32 to vector<1x8xi32>
    %80 = arith.cmpi ne, %78, %79 : vector<1x8xi32>
    %cst_17 = arith.constant 1.000000e+00 : f32
    %cst_18 = arith.constant -1.000000e+00 : f32
    %81 = vector.broadcast %cst_17 : f32 to vector<1x8xf32>
    %82 = vector.broadcast %cst_18 : f32 to vector<1x8xf32>
    %83 = arith.select %80, %81, %82 : vector<1x8xi1>, vector<1x8xf32>
    %84 = arith.mulf %8, %41 : vector<2x1xf32>
    %85 = vector.broadcast %69 : vector<1x8xf32> to vector<2x8xf32>
    %86 = vector.broadcast %84 : vector<2x1xf32> to vector<2x8xf32>
    %87 = arith.mulf %85, %86 : vector<2x8xf32>
    %88 = vector.broadcast %3 : vector<2x1xf32> to vector<2x8xf32>
    %89 = arith.addf %88, %87 : vector<2x8xf32>
    %90 = arith.mulf %11, %50 : vector<2x1xf32>
    %91 = vector.broadcast %76 : vector<1x8xf32> to vector<2x8xf32>
    %92 = vector.broadcast %90 : vector<2x1xf32> to vector<2x8xf32>
    %93 = arith.mulf %91, %92 : vector<2x8xf32>
    %94 = arith.addf %89, %93 : vector<2x8xf32>
    %95 = arith.mulf %14, %55 : vector<2x1xf32>
    %96 = vector.broadcast %83 : vector<1x8xf32> to vector<2x8xf32>
    %97 = vector.broadcast %95 : vector<2x1xf32> to vector<2x8xf32>
    %98 = arith.mulf %96, %97 : vector<2x8xf32>
    %99 = arith.addf %94, %98 : vector<2x8xf32>
    %100 = arith.mulf %8, %42 : vector<2x1xf32>
    %101 = vector.broadcast %69 : vector<1x8xf32> to vector<2x8xf32>
    %102 = vector.broadcast %100 : vector<2x1xf32> to vector<2x8xf32>
    %103 = arith.mulf %101, %102 : vector<2x8xf32>
    %104 = vector.broadcast %4 : vector<2x1xf32> to vector<2x8xf32>
    %105 = arith.addf %104, %103 : vector<2x8xf32>
    %106 = arith.mulf %11, %51 : vector<2x1xf32>
    %107 = vector.broadcast %76 : vector<1x8xf32> to vector<2x8xf32>
    %108 = vector.broadcast %106 : vector<2x1xf32> to vector<2x8xf32>
    %109 = arith.mulf %107, %108 : vector<2x8xf32>
    %110 = arith.addf %105, %109 : vector<2x8xf32>
    %111 = arith.mulf %14, %58 : vector<2x1xf32>
    %112 = vector.broadcast %83 : vector<1x8xf32> to vector<2x8xf32>
    %113 = vector.broadcast %111 : vector<2x1xf32> to vector<2x8xf32>
    %114 = arith.mulf %112, %113 : vector<2x8xf32>
    %115 = arith.addf %110, %114 : vector<2x8xf32>
    %116 = arith.mulf %8, %43 : vector<2x1xf32>
    %117 = vector.broadcast %69 : vector<1x8xf32> to vector<2x8xf32>
    %118 = vector.broadcast %116 : vector<2x1xf32> to vector<2x8xf32>
    %119 = arith.mulf %117, %118 : vector<2x8xf32>
    %120 = vector.broadcast %5 : vector<2x1xf32> to vector<2x8xf32>
    %121 = arith.addf %120, %119 : vector<2x8xf32>
    %122 = arith.mulf %11, %52 : vector<2x1xf32>
    %123 = vector.broadcast %76 : vector<1x8xf32> to vector<2x8xf32>
    %124 = vector.broadcast %122 : vector<2x1xf32> to vector<2x8xf32>
    %125 = arith.mulf %123, %124 : vector<2x8xf32>
    %126 = arith.addf %121, %125 : vector<2x8xf32>
    %127 = arith.mulf %14, %61 : vector<2x1xf32>
    %128 = vector.broadcast %83 : vector<1x8xf32> to vector<2x8xf32>
    %129 = vector.broadcast %127 : vector<2x1xf32> to vector<2x8xf32>
    %130 = arith.mulf %128, %129 : vector<2x8xf32>
    %131 = arith.addf %126, %130 : vector<2x8xf32>
    %132 = vector.extract_strided_slice %2 {offsets = [0, 0], sizes = [2, 1], strides = [1, 1]} : vector<2x24xf32> to vector<2x1xf32>
    %133 = vector.extract_strided_slice %2 {offsets = [0, 1], sizes = [2, 1], strides = [1, 1]} : vector<2x24xf32> to vector<2x1xf32>
    %134 = vector.extract_strided_slice %2 {offsets = [0, 2], sizes = [2, 1], strides = [1, 1]} : vector<2x24xf32> to vector<2x1xf32>
    %135 = vector.broadcast %132 : vector<2x1xf32> to vector<2x8xf32>
    %136 = arith.subf %99, %135 : vector<2x8xf32>
    %137 = arith.mulf %136, %136 : vector<2x8xf32>
    %138 = vector.broadcast %133 : vector<2x1xf32> to vector<2x8xf32>
    %139 = arith.subf %115, %138 : vector<2x8xf32>
    %140 = arith.mulf %139, %139 : vector<2x8xf32>
    %141 = arith.addf %137, %140 : vector<2x8xf32>
    %142 = vector.broadcast %134 : vector<2x1xf32> to vector<2x8xf32>
    %143 = arith.subf %131, %142 : vector<2x8xf32>
    %144 = arith.mulf %143, %143 : vector<2x8xf32>
    %145 = arith.addf %141, %144 : vector<2x8xf32>
    %cst_19 = arith.constant dense<0x7F800000> : vector<2xf32>
    %146 = vector.multi_reduction <minimumf>, %145, %cst_19 [1] : vector<2x8xf32> to vector<2xf32>
    %147 = vector.shape_cast %146 : vector<2xf32> to vector<2x1xf32>
    %148 = vector.extract_strided_slice %2 {offsets = [0, 3], sizes = [2, 1], strides = [1, 1]} : vector<2x24xf32> to vector<2x1xf32>
    %149 = vector.extract_strided_slice %2 {offsets = [0, 4], sizes = [2, 1], strides = [1, 1]} : vector<2x24xf32> to vector<2x1xf32>
    %150 = vector.extract_strided_slice %2 {offsets = [0, 5], sizes = [2, 1], strides = [1, 1]} : vector<2x24xf32> to vector<2x1xf32>
    %151 = vector.broadcast %148 : vector<2x1xf32> to vector<2x8xf32>
    %152 = arith.subf %99, %151 : vector<2x8xf32>
    %153 = arith.mulf %152, %152 : vector<2x8xf32>
    %154 = vector.broadcast %149 : vector<2x1xf32> to vector<2x8xf32>
    %155 = arith.subf %115, %154 : vector<2x8xf32>
    %156 = arith.mulf %155, %155 : vector<2x8xf32>
    %157 = arith.addf %153, %156 : vector<2x8xf32>
    %158 = vector.broadcast %150 : vector<2x1xf32> to vector<2x8xf32>
    %159 = arith.subf %131, %158 : vector<2x8xf32>
    %160 = arith.mulf %159, %159 : vector<2x8xf32>
    %161 = arith.addf %157, %160 : vector<2x8xf32>
    %162 = arith.minimumf %145, %161 : vector<2x8xf32>
    %cst_20 = arith.constant dense<0x7F800000> : vector<2xf32>
    %163 = vector.multi_reduction <minimumf>, %161, %cst_20 [1] : vector<2x8xf32> to vector<2xf32>
    %164 = vector.shape_cast %163 : vector<2xf32> to vector<2x1xf32>
    %165 = arith.addf %147, %164 : vector<2x1xf32>
    %166 = vector.extract_strided_slice %2 {offsets = [0, 6], sizes = [2, 1], strides = [1, 1]} : vector<2x24xf32> to vector<2x1xf32>
    %167 = vector.extract_strided_slice %2 {offsets = [0, 7], sizes = [2, 1], strides = [1, 1]} : vector<2x24xf32> to vector<2x1xf32>
    %168 = vector.extract_strided_slice %2 {offsets = [0, 8], sizes = [2, 1], strides = [1, 1]} : vector<2x24xf32> to vector<2x1xf32>
    %169 = vector.broadcast %166 : vector<2x1xf32> to vector<2x8xf32>
    %170 = arith.subf %99, %169 : vector<2x8xf32>
    %171 = arith.mulf %170, %170 : vector<2x8xf32>
    %172 = vector.broadcast %167 : vector<2x1xf32> to vector<2x8xf32>
    %173 = arith.subf %115, %172 : vector<2x8xf32>
    %174 = arith.mulf %173, %173 : vector<2x8xf32>
    %175 = arith.addf %171, %174 : vector<2x8xf32>
    %176 = vector.broadcast %168 : vector<2x1xf32> to vector<2x8xf32>
    %177 = arith.subf %131, %176 : vector<2x8xf32>
    %178 = arith.mulf %177, %177 : vector<2x8xf32>
    %179 = arith.addf %175, %178 : vector<2x8xf32>
    %180 = arith.minimumf %162, %179 : vector<2x8xf32>
    %cst_21 = arith.constant dense<0x7F800000> : vector<2xf32>
    %181 = vector.multi_reduction <minimumf>, %179, %cst_21 [1] : vector<2x8xf32> to vector<2xf32>
    %182 = vector.shape_cast %181 : vector<2xf32> to vector<2x1xf32>
    %183 = arith.addf %165, %182 : vector<2x1xf32>
    %184 = vector.extract_strided_slice %2 {offsets = [0, 9], sizes = [2, 1], strides = [1, 1]} : vector<2x24xf32> to vector<2x1xf32>
    %185 = vector.extract_strided_slice %2 {offsets = [0, 10], sizes = [2, 1], strides = [1, 1]} : vector<2x24xf32> to vector<2x1xf32>
    %186 = vector.extract_strided_slice %2 {offsets = [0, 11], sizes = [2, 1], strides = [1, 1]} : vector<2x24xf32> to vector<2x1xf32>
    %187 = vector.broadcast %184 : vector<2x1xf32> to vector<2x8xf32>
    %188 = arith.subf %99, %187 : vector<2x8xf32>
    %189 = arith.mulf %188, %188 : vector<2x8xf32>
    %190 = vector.broadcast %185 : vector<2x1xf32> to vector<2x8xf32>
    %191 = arith.subf %115, %190 : vector<2x8xf32>
    %192 = arith.mulf %191, %191 : vector<2x8xf32>
    %193 = arith.addf %189, %192 : vector<2x8xf32>
    %194 = vector.broadcast %186 : vector<2x1xf32> to vector<2x8xf32>
    %195 = arith.subf %131, %194 : vector<2x8xf32>
    %196 = arith.mulf %195, %195 : vector<2x8xf32>
    %197 = arith.addf %193, %196 : vector<2x8xf32>
    %198 = arith.minimumf %180, %197 : vector<2x8xf32>
    %cst_22 = arith.constant dense<0x7F800000> : vector<2xf32>
    %199 = vector.multi_reduction <minimumf>, %197, %cst_22 [1] : vector<2x8xf32> to vector<2xf32>
    %200 = vector.shape_cast %199 : vector<2xf32> to vector<2x1xf32>
    %201 = arith.addf %183, %200 : vector<2x1xf32>
    %202 = vector.extract_strided_slice %2 {offsets = [0, 12], sizes = [2, 1], strides = [1, 1]} : vector<2x24xf32> to vector<2x1xf32>
    %203 = vector.extract_strided_slice %2 {offsets = [0, 13], sizes = [2, 1], strides = [1, 1]} : vector<2x24xf32> to vector<2x1xf32>
    %204 = vector.extract_strided_slice %2 {offsets = [0, 14], sizes = [2, 1], strides = [1, 1]} : vector<2x24xf32> to vector<2x1xf32>
    %205 = vector.broadcast %202 : vector<2x1xf32> to vector<2x8xf32>
    %206 = arith.subf %99, %205 : vector<2x8xf32>
    %207 = arith.mulf %206, %206 : vector<2x8xf32>
    %208 = vector.broadcast %203 : vector<2x1xf32> to vector<2x8xf32>
    %209 = arith.subf %115, %208 : vector<2x8xf32>
    %210 = arith.mulf %209, %209 : vector<2x8xf32>
    %211 = arith.addf %207, %210 : vector<2x8xf32>
    %212 = vector.broadcast %204 : vector<2x1xf32> to vector<2x8xf32>
    %213 = arith.subf %131, %212 : vector<2x8xf32>
    %214 = arith.mulf %213, %213 : vector<2x8xf32>
    %215 = arith.addf %211, %214 : vector<2x8xf32>
    %216 = arith.minimumf %198, %215 : vector<2x8xf32>
    %cst_23 = arith.constant dense<0x7F800000> : vector<2xf32>
    %217 = vector.multi_reduction <minimumf>, %215, %cst_23 [1] : vector<2x8xf32> to vector<2xf32>
    %218 = vector.shape_cast %217 : vector<2xf32> to vector<2x1xf32>
    %219 = arith.addf %201, %218 : vector<2x1xf32>
    %220 = vector.extract_strided_slice %2 {offsets = [0, 15], sizes = [2, 1], strides = [1, 1]} : vector<2x24xf32> to vector<2x1xf32>
    %221 = vector.extract_strided_slice %2 {offsets = [0, 16], sizes = [2, 1], strides = [1, 1]} : vector<2x24xf32> to vector<2x1xf32>
    %222 = vector.extract_strided_slice %2 {offsets = [0, 17], sizes = [2, 1], strides = [1, 1]} : vector<2x24xf32> to vector<2x1xf32>
    %223 = vector.broadcast %220 : vector<2x1xf32> to vector<2x8xf32>
    %224 = arith.subf %99, %223 : vector<2x8xf32>
    %225 = arith.mulf %224, %224 : vector<2x8xf32>
    %226 = vector.broadcast %221 : vector<2x1xf32> to vector<2x8xf32>
    %227 = arith.subf %115, %226 : vector<2x8xf32>
    %228 = arith.mulf %227, %227 : vector<2x8xf32>
    %229 = arith.addf %225, %228 : vector<2x8xf32>
    %230 = vector.broadcast %222 : vector<2x1xf32> to vector<2x8xf32>
    %231 = arith.subf %131, %230 : vector<2x8xf32>
    %232 = arith.mulf %231, %231 : vector<2x8xf32>
    %233 = arith.addf %229, %232 : vector<2x8xf32>
    %234 = arith.minimumf %216, %233 : vector<2x8xf32>
    %cst_24 = arith.constant dense<0x7F800000> : vector<2xf32>
    %235 = vector.multi_reduction <minimumf>, %233, %cst_24 [1] : vector<2x8xf32> to vector<2xf32>
    %236 = vector.shape_cast %235 : vector<2xf32> to vector<2x1xf32>
    %237 = arith.addf %219, %236 : vector<2x1xf32>
    %238 = vector.extract_strided_slice %2 {offsets = [0, 18], sizes = [2, 1], strides = [1, 1]} : vector<2x24xf32> to vector<2x1xf32>
    %239 = vector.extract_strided_slice %2 {offsets = [0, 19], sizes = [2, 1], strides = [1, 1]} : vector<2x24xf32> to vector<2x1xf32>
    %240 = vector.extract_strided_slice %2 {offsets = [0, 20], sizes = [2, 1], strides = [1, 1]} : vector<2x24xf32> to vector<2x1xf32>
    %241 = vector.broadcast %238 : vector<2x1xf32> to vector<2x8xf32>
    %242 = arith.subf %99, %241 : vector<2x8xf32>
    %243 = arith.mulf %242, %242 : vector<2x8xf32>
    %244 = vector.broadcast %239 : vector<2x1xf32> to vector<2x8xf32>
    %245 = arith.subf %115, %244 : vector<2x8xf32>
    %246 = arith.mulf %245, %245 : vector<2x8xf32>
    %247 = arith.addf %243, %246 : vector<2x8xf32>
    %248 = vector.broadcast %240 : vector<2x1xf32> to vector<2x8xf32>
    %249 = arith.subf %131, %248 : vector<2x8xf32>
    %250 = arith.mulf %249, %249 : vector<2x8xf32>
    %251 = arith.addf %247, %250 : vector<2x8xf32>
    %252 = arith.minimumf %234, %251 : vector<2x8xf32>
    %cst_25 = arith.constant dense<0x7F800000> : vector<2xf32>
    %253 = vector.multi_reduction <minimumf>, %251, %cst_25 [1] : vector<2x8xf32> to vector<2xf32>
    %254 = vector.shape_cast %253 : vector<2xf32> to vector<2x1xf32>
    %255 = arith.addf %237, %254 : vector<2x1xf32>
    %256 = vector.extract_strided_slice %2 {offsets = [0, 21], sizes = [2, 1], strides = [1, 1]} : vector<2x24xf32> to vector<2x1xf32>
    %257 = vector.extract_strided_slice %2 {offsets = [0, 22], sizes = [2, 1], strides = [1, 1]} : vector<2x24xf32> to vector<2x1xf32>
    %258 = vector.extract_strided_slice %2 {offsets = [0, 23], sizes = [2, 1], strides = [1, 1]} : vector<2x24xf32> to vector<2x1xf32>
    %259 = vector.broadcast %256 : vector<2x1xf32> to vector<2x8xf32>
    %260 = arith.subf %99, %259 : vector<2x8xf32>
    %261 = arith.mulf %260, %260 : vector<2x8xf32>
    %262 = vector.broadcast %257 : vector<2x1xf32> to vector<2x8xf32>
    %263 = arith.subf %115, %262 : vector<2x8xf32>
    %264 = arith.mulf %263, %263 : vector<2x8xf32>
    %265 = arith.addf %261, %264 : vector<2x8xf32>
    %266 = vector.broadcast %258 : vector<2x1xf32> to vector<2x8xf32>
    %267 = arith.subf %131, %266 : vector<2x8xf32>
    %268 = arith.mulf %267, %267 : vector<2x8xf32>
    %269 = arith.addf %265, %268 : vector<2x8xf32>
    %270 = arith.minimumf %252, %269 : vector<2x8xf32>
    %cst_26 = arith.constant dense<0x7F800000> : vector<2xf32>
    %271 = vector.multi_reduction <minimumf>, %269, %cst_26 [1] : vector<2x8xf32> to vector<2xf32>
    %272 = vector.shape_cast %271 : vector<2xf32> to vector<2x1xf32>
    %273 = arith.addf %255, %272 : vector<2x1xf32>
    %274 = vector.shape_cast %270 : vector<2x8xf32> to vector<1x2x8xf32>
    %cst_27 = arith.constant dense<0.000000e+00> : vector<1xf32>
    %275 = vector.multi_reduction <add>, %274, %cst_27 [1, 2] : vector<1x2x8xf32> to vector<1xf32>
    %276 = vector.shape_cast %275 : vector<1xf32> to vector<1x1x1xf32>
    %277 = vector.extract %276[0, 0, 0] : f32 from vector<1x1x1xf32>
    %278 = vector.shape_cast %273 : vector<2x1xf32> to vector<1x2x1xf32>
    %cst_28 = arith.constant dense<0.000000e+00> : vector<1xf32>
    %279 = vector.multi_reduction <add>, %278, %cst_28 [1, 2] : vector<1x2x1xf32> to vector<1xf32>
    %280 = vector.shape_cast %279 : vector<1xf32> to vector<1x1x1xf32>
    %281 = vector.extract %280[0, 0, 0] : f32 from vector<1x1x1xf32>
    %282 = arith.addf %277, %281 : f32
    %cst_29 = arith.constant 1.600000e+01 : f32
    %283 = arith.divf %282, %cst_29 : f32
    %284 = tpu.iota {dimensions = array<i32: 1>} : vector<1x128xi32>
    %c0_i32_30 = arith.constant 0 : i32
    %285 = vector.broadcast %c0_i32_30 : i32 to vector<1x128xi32>
    %286 = arith.cmpi eq, %284, %285 : vector<1x128xi32>
    %cst_31 = arith.constant 0.000000e+00 : f32
    %287 = vector.broadcast %28 : f32 to vector<1x128xf32>
    %288 = vector.broadcast %cst_31 : f32 to vector<1x128xf32>
    %289 = arith.select %286, %287, %288 : vector<1x128xi1>, vector<1x128xf32>
    %c1_i32_32 = arith.constant 1 : i32
    %290 = vector.broadcast %c1_i32_32 : i32 to vector<1x128xi32>
    %291 = arith.cmpi eq, %284, %290 : vector<1x128xi32>
    %cst_33 = arith.constant 0.000000e+00 : f32
    %292 = vector.broadcast %34 : f32 to vector<1x128xf32>
    %293 = vector.broadcast %cst_33 : f32 to vector<1x128xf32>
    %294 = arith.select %291, %292, %293 : vector<1x128xi1>, vector<1x128xf32>
    %295 = arith.addf %289, %294 : vector<1x128xf32>
    %c2_i32_34 = arith.constant 2 : i32
    %296 = vector.broadcast %c2_i32_34 : i32 to vector<1x128xi32>
    %297 = arith.cmpi eq, %284, %296 : vector<1x128xi32>
    %cst_35 = arith.constant 0.000000e+00 : f32
    %298 = vector.broadcast %283 : f32 to vector<1x128xf32>
    %299 = vector.broadcast %cst_35 : f32 to vector<1x128xf32>
    %300 = arith.select %297, %298, %299 : vector<1x128xi1>, vector<1x128xf32>
    %301 = arith.addf %295, %300 : vector<1x128xf32>
    %c0_36 = arith.constant 0 : index
    %c0_37 = arith.constant 0 : index
    %302 = vector.load %arg3[%c0_36, %c0_37] : memref<1x128xf32, #tpu.memory_space<vmem>>, vector<1x128xf32>
    tpu.vector_store %arg3[%c0_36, %c0_37], %301 {strides = array<i32>} : memref<1x128xf32, #tpu.memory_space<vmem>>, vector<1x128xf32>,
    return
  }
}

</mosaic_0001>

<bundles_post_ra>
// kernel: tpu_custom_call.1
= control target key start
LH: loop header
LB: loop body
LE: loop exit
PB: predicated region body
PF: predicated region fallthrough
CT: control target
= control target key end

     0   :  { %8 = vsyncpa [#allocation3], 0  ;;  %s911_s0 = inlined_call_operand.hbm [shape: f32[2,24], index: 0, kind: input, shape index: {}]   ;;  %s912_s1 = inlined_call_operand.vmem [shape: f32[2,3], index: 1, kind: input, shape index: {}]   ;;  %s913_s2 = inlined_call_operand.vmem [shape: f32[2,24], index: 2, kind: input, shape index: {}]   ;;  %s914_s3 = inlined_call_operand.hbm [shape: f32[1,128], index: 3, kind: output, shape index: {}]  }
   0x1   :  { %9 = vsyncpa [#allocation4], 0  ;;  %s634_s12 = smov [#allocation2]   ;;  %s586_s16 = scalar_lea.hbm %s911_s0, 32 }
   0x2   :  { %s16_s13 = sshll.u32 %s634_s12, 4  ;;  %p587_p0 = scmp.ne.s32.totalorder %s911_s0, %s586_s16  ;;  %s17_s13 = int_to_ptr.vmem [resolvable:$true] %s16_s13 }
   0x3   :  { %p590_p1 = scmp.lt.u32.totalorder %s586_s16, %s911_s0 }
   0x5   :  { %p592_p2 = pnand %p590_p1, %p587_p0 }
   0x7   :  { %595 = shalt.err (!%p592_p2)
}
   0x8   :  { %s596_s21 = scalar_lea.vmem %s17_s13, 32  ;;  %p601_p4 = scmp.lt.s32.totalorder %s17_s13, %s17_s13 }
   0x9   :  { %p597_p3 = scmp.ne.s32.totalorder %s17_s13, %s596_s21  ;;  %p602_p5 = scmp.lt.s32.totalorder %s596_s21, %s596_s21 }
   0xb   :  { %p603_p6 = por %p602_p5, %p601_p4 }
   0xd   :  { %p604_p7 = pnand %p603_p6, %p597_p3 }
   0xf   :  { %607 = shalt.err (!%p604_p7)
}
  0x10   :  { %19 = dma.hbm_to_vmem [thread:$0]  %s911_s0, 32, %s17_s13, [#allocation3]  }
  0x11   :  { %630 = dma.done.wait [#allocation3], 32  }
  0x12   :  { %631 = vsyncadd [#allocation3], 4294967264  ;;  %v704_v0 = vld [vmem:[#allocation2] sm:$0x3]  ;;  %s635_s24 = smov 127   ;;  %s636_s25 = smov 126   ;;  %v132_v54 = vlaneseq }
  0x13   :  { %v69_v1 = vmul.f32 %v704_v0, %v704_v0  ;;  %v28_v2 = vld [vmem:[%s912_s1] sm:$0x3]  ;;  %s637_s28 = smov 12   ;;  %s638_s0 = smov 116   ;;  %vm41_vm0 = vcmask 17408   ;;  %v643_v27 = vmov 12  }
  0x14   :  { %s639_s29 = smov 1   ;;  %s640_s30 = smov 2   ;;  %551 = vset.pattern.permute.xlu0 %v643_v27  ;;  %v644_v28 = vmov 15   ;;  %v755_v45 = vmul.f32 0.5, %v704_v0  ;;  %v646_v53 = vmov 16   ;;  %v763_v56 = vand.u32 127, %v132_v54 }
  0x15   :  { %71 = vrot.lane.b32.xlu0 %v69_v1, %s635_s24  ;;  %s641_s1 = smov 123   ;;  %s642_s4 = smov 124   ;;  %550 = vset.pattern.permute.xlu1 %v644_v28  ;;  %v647_v59 = vmov -1.0   ;;  %vm273_vm4 = vcmask 58368   ;;  %vm462_vm5 = vcmask 1024  }
  0x16   :  { %s645_s5 = smov 125   ;;  %v134_v57 = vand.u32 4, %v763_v56  ;;  %s649_s6 = smov 122   ;;  %vm480_vm6 = vcmp.eq.s32.totalorder %v763_v56, 1  ;;  %vm477_vm7 = vcmp.eq.s32.totalorder %v763_v56, 0  ;;  %vm484_vm8 = vcmp.eq.s32.totalorder %v763_v56, 2 }
  0x17   :  { %s651_s7 = smov 121   ;;  %s671_s17 = smov [#allocation5]  }
  0x18   :  { %vm135_vm1 = vcmp.ne.s32.totalorder %v134_v57, 0  ;;  %s495_s18 = sshll.u32 %s671_s17, 4  ;;  %s496_s18 = int_to_ptr.vmem [resolvable:$true] %s495_s18 }
  0x19   :  { %75 = vrot.lane.b32.xlu0 %v69_v1, %s636_s25  ;;  %v767_v60 = vsel %vm135_vm1, 1.0, %v647_v59  ;;  %s608_s19 = scalar_lea.vmem %s496_s18, 16  ;;  %s612_s20 = scalar_lea.vmem %s496_s18, 32 }
  0x1a   :  { %p609_p8 = scmp.ne.s32.totalorder %s496_s18, %s608_s19  ;;  %p613_p9 = scmp.lt.s32.totalorder %s496_s18, %s496_s18 }
  0x1b   :  { %p614_p10 = scmp.lt.s32.totalorder %s612_s20, %s608_s19 }
  0x1d   :  { %32 = vrot.lane.b32.xlu0 %v28_v2, %s637_s28  ;;  %p615_p11 = por %p614_p10, %p613_p9 }
  0x1f   :  { %p616_p12 = pnand %p615_p11, %p609_p8 }
  0x87   :  { %v72_v3 = vpop.permute.xlu0 %71 }
  0x88   :  { %v74_v4 = vadd.f32 %v72_v3, %v69_v1 }
  0x8b   :  { %v76_v5 = vpop.permute.xlu0 %75 }
  0x8c   :  { %v78_v6 = vadd.f32 %v76_v5, %v74_v4  ;;  %v648_v4 = vmov 13   ;;  %v650_v5 = vmov 14  }
  0x8e   :  { %584 = vrsqrt.f32 %v78_v6 }
  0x8f   :  { %v33_v7 = vpop.permute.xlu0 %32 }
  0x90   :  { %v35_v8 = vsub.f32 %v704_v0, %v33_v7 }
  0x92   :  { %v36_v9 = vand.u32 2147483647, %v35_v8  ;;  %v53_v16 = vmul.f32 %v35_v8, %v35_v8  ;;  %v137_v8 = vand.u32 2, %v763_v56 }
  0x94   :  { %38 = vrot.lane.b32.xlu0 %v36_v9, %s638_s0  ;;  %vm138_vm2 = vcmp.ne.s32.totalorder %v137_v8, 0 }
  0x95   :  { %v782_v9 = vsel %vm138_vm2, 1.0, %v647_v59 }
  0x98   :  { %v585_v10 = vpop.eup %584 }
  0x99   :  { %82 = vrot.lane.b32.xlu1 %v585_v10, %s639_s29  ;;  %v715_v11 = vmul.f32 %v585_v10, %v704_v0 }
  0x9d   :  { %86 = vrot.lane.b32.xlu1 %v585_v10, %s640_s30 }
  0xa1   :  { %123 = vrot.lane.b32.xlu1 %v715_v11, %s636_s25 }
 0x106   :  { %v39_v17 = vpop.permute.xlu0 %38 }
 0x107   :  { %v42_v18 = vsel %vm41_vm0, %v39_v17, 0.0 }
 0x10b   :  { %v83_v12 = vpop.permute.xlu1 %82 }
 0x10c   :  { %v720_v13 = vmul.f32 %v83_v12, %v704_v0 }
 0x10e   :  { %96 = vrot.lane.b32.xlu1 %v720_v13, %s636_s25 }
 0x10f   :  { %v87_v14 = vpop.permute.xlu1 %86 }
 0x110   :  { %v725_v15 = vmul.f32 %v87_v14, %v704_v0 }
 0x112   :  { %110 = vrot.lane.b32.xlu0 %v725_v15, %s641_s1 }
 0x113   :  { %v124_v19 = vpop.permute.xlu1 %123 }
 0x114   :  { %v126_v25 = vmul.f32 %v124_v19, %v720_v13 }
 0x116   :  { %55 = vrot.lane.b32.xlu0 %v53_v16, %s638_s0 }
 0x132   :  { %43 = vadd.xlane.f32.xlu1 %v42_v18 }
 0x143   :  { %91 = vrot.lane.b32.xlu1 %v725_v15, %s642_s4 }
 0x180   :  { %v97_v20 = vpop.permute.xlu1 %96 }
 0x181   :  { %v99_v21 = vmul.f32 %v97_v20, %v725_v15 }
 0x183   :  { %101 = vrot.lane.b32.xlu1 %v99_v21, %s635_s24 }
 0x184   :  { %v732_v22 = vpop.permute.xlu0 %110 }
 0x185   :  { %v113_v23 = vmul.f32 %v732_v22, %v715_v11 }
 0x187   :  { %115 = vrot.lane.b32.xlu1 %v113_v23, %s640_s30  ;;  %v652_v23 = vmov 2  }
 0x188   :  { %v56_v24 = vpop.permute.xlu0 %55 }
 0x189   :  { %v58_v26 = vsel %vm41_vm0, %v56_v24, 0.0 }
 0x18a   :  { %59 = vadd.xlane.f32.xlu0 %v58_v26  ;;  %v655_v26 = vmov 1  }
 0x18b   :  { %128 = vrot.lane.b32.xlu1 %v126_v25, %s635_s24  ;;  %v654_v25 = vmov 3  }
 0x1a0   :  { %106 = vrot.lane.b32.xlu0 %v715_v11, %s635_s24 }
 0x1a4   :  { %119 = vrot.lane.b32.xlu0 %v720_v13, %s642_s4 }
 0x1a8   :  { %143 = vrot.lane.b32.xlu0 %v715_v11, %s645_s5 }
 0x1ac   :  { %155 = vperm.xlu0 %551, %v704_v0  }
 0x1b0   :  { %555 = vset.pattern.permute.xlu0 %v644_v28 }
 0x1bf   :  { %v44_v29 = vpop.xlane.xlu1 %43 }
 0x1c0   :  { %v45_v30 = vrot.slane %v44_v29, 4 }
 0x1c2   :  { %v46_v31 = vadd.f32 %v45_v30, %v44_v29  ;;  %v656_v29 = vmov 4   ;;  %v657_v30 = vmov 7  }
 0x1c3   :  { %v92_v36 = vpop.permute.xlu1 %91 }
 0x1c4   :  { %v47_v32 = vrot.slane %v46_v31, 2  ;;  %v748_v37 = vmul.f32 %v92_v36, %v720_v13  ;;  %v664_v36 = vmov 17  }
 0x1c6   :  { %v48_v33 = vadd.f32 %v47_v32, %v46_v31  ;;  %v658_v31 = vmov 5   ;;  %v659_v32 = vmov 10  }
 0x1c8   :  { %v49_v34 = vrot.slane %v48_v33, 1 }
 0x1ca   :  { %v50_v35 = vadd.f32 %v49_v34, %v48_v33  ;;  %v660_v33 = vmov 6   ;;  %v661_v34 = vmov 8  }
 0x1cc   :  { %504 = vpush %v50_v35  ;;  %v662_v35 = vmov 9  }
 0x1f5   :  { %v750_v38 = vpop.permute.xlu1 %101 }
 0x1f6   :  { %v104_v39 = vsub.f32 %v748_v37, %v750_v38 }
 0x1f9   :  { %v116_v55 = vpop.permute.xlu1 %115 }
 0x1fd   :  { %v129_v58 = vpop.permute.xlu1 %128 }
 0x217   :  { %v60_v40 = vpop.xlane.xlu0 %59 }
 0x218   :  { %v61_v41 = vrot.slane %v60_v40, 4 }
 0x21a   :  { %v62_v42 = vadd.f32 %v61_v41, %v60_v40 }
 0x21b   :  { %v107_v43 = vpop.permute.xlu0 %106 }
 0x21c   :  { %v63_v44 = vrot.slane %v62_v42, 2  ;;  %v109_v6 = vmul.f32 %v107_v43, %v725_v15 }
 0x21e   :  { %v64_v46 = vadd.f32 %v63_v44, %v62_v42  ;;  %v118_v7 = vsub.f32 %v109_v6, %v116_v55 }
 0x21f   :  { %v120_v47 = vpop.permute.xlu0 %119 }
 0x220   :  { %v182_v48 = vmul.f32 %v120_v47, %v755_v45  ;;  %v65_v49 = vrot.slane %v64_v46, 1  ;;  %v122_v19 = vmul.f32 %v120_v47, %v715_v11 }
 0x222   :  { %185 = vperm.xlu0 %555, %v182_v48   ;;  %v66_v50 = vadd.f32 %v65_v49, %v64_v46  ;;  %v131_v24 = vsub.f32 %v122_v19, %v129_v58  ;;  %v665_v49 = vmov 20  }
 0x223   :  { %v144_v51 = vpop.permute.xlu0 %143 }
 0x224   :  { %v146_v52 = vmul.f32 %v144_v51, %v755_v45  ;;  %506 = vpush %v66_v50  ;;  %v666_v50 = vmov 18   ;;  %v667_v51 = vmov 23  }
 0x226   :  { %149 = vperm.xlu1 %550, %v146_v52   ;;  %556 = vset.pattern.permute.xlu0 %v646_v53  ;;  %v668_v52 = vmov 19  }
 0x22a   :  { %159 = vrot.lane.b32.xlu1 %v715_v11, %s641_s1  ;;  %v653_v11 = vmov 0  }
 0x22b   :  { %552 = vset.pattern.permute.xlu1 %v646_v53  ;;  %v156_v63 = vpop.permute.xlu0 %155 }
 0x2a5   :  { %v150_v61 = vpop.permute.xlu1 %149 }
 0x2a6   :  { %v152_v62 = vmul.f32 %v150_v61, %v767_v60 }
 0x2a8   :  { %v158_v1 = vadd.f32 %v156_v63, %v152_v62 }
 0x2a9   :  { %v160_v2 = vpop.permute.xlu1 %159 }
 0x2aa   :  { %v162_v3 = vmul.f32 %v160_v2, %v755_v45 }
 0x2ac   :  { %165 = vperm.xlu1 %552, %v162_v3  }
 0x2b0   :  { %553 = vset.pattern.permute.xlu1 %v648_v4 }
 0x2b1   :  { %190 = vperm.xlu1 %553, %v704_v0  }
 0x2b5   :  { %194 = vrot.lane.b32.xlu1 %v720_v13, %s649_s6 }
 0x2b6   :  { %554 = vset.pattern.permute.xlu1 %v650_v5 }
 0x2b9   :  { %225 = vperm.xlu1 %554, %v704_v0  }
 0x2bd   :  { %206 = vrot.lane.b32.xlu1 %v118_v7, %s645_s5 }
 0x2be   :  { %558 = vset.pattern.permute.xlu1 %v646_v53 }
 0x2c1   :  { %229 = vrot.lane.b32.xlu1 %v725_v15, %s651_s7  ;;  %v217_v15 = vmul.f32 %v732_v22, %v755_v45  ;;  %v807_v22 = vld [vmem:[%s913_s2] sm:$0x3]  ;;  %s505_s2 = spop %504 }
 0x2c2   :  { %s507_s10 = spop %506  ;;  %s52_s12 = smul.f32 0.16666667, %s505_s2 }
 0x2c3   :  { %s68_s11 = smul.f32 0.16666667, %s507_s10 }
 0x32b   :  { %v166_v10 = vpop.permute.xlu1 %165 }
 0x32c   :  { %v168_v12 = vmul.f32 %v166_v10, %v782_v9 }
 0x32e   :  { %v785_v13 = vadd.f32 %v168_v12, %v158_v1  ;;  %v140_v12 = vand.u32 1, %v763_v56 }
 0x330   :  { %v787_v0 = vpop.permute.xlu1 %190  ;;  %vm141_vm3 = vcmp.ne.s32.totalorder %v140_v12, 0 }
 0x334   :  { %v195_v14 = vpop.permute.xlu1 %194 }
 0x335   :  { %v197_v16 = vmul.f32 %v195_v14, %v755_v45 }
 0x337   :  { %200 = vperm.xlu0 %556, %v197_v16  }
 0x338   :  { %v790_v17 = vpop.permute.xlu1 %225 }
 0x33b   :  { %557 = vset.pattern.permute.xlu0 %v644_v28 }
 0x33c   :  { %220 = vperm.xlu0 %557, %v217_v15   ;;  %v795_v18 = vpop.permute.xlu1 %206 }
 0x33d   :  { %v209_v47 = vmul.f32 %v795_v18, %v755_v45  ;;  %v142_v18 = vsel %vm141_vm3, 1.0, %v647_v59 }
 0x340   :  { %171 = vrot.lane.b32.xlu0 %v104_v39, %s636_s25  ;;  %v230_v20 = vpop.permute.xlu1 %229 }
 0x341   :  { %v232_v21 = vmul.f32 %v230_v20, %v755_v45  ;;  %561 = vset.pattern.permute.xlu0 %v652_v23 }
 0x343   :  { %235 = vperm.xlu1 %558, %v232_v21  }
 0x344   :  { %241 = vrot.lane.b32.xlu0 %v131_v24, %s635_s24 }
 0x347   :  { %559 = vset.pattern.permute.xlu1 %v653_v11 }
 0x348   :  { %267 = vperm.xlu0 %561, %v807_v22   ;;  %254 = vperm.xlu1 %559, %v807_v22  }
 0x34c   :  { %562 = vset.pattern.permute.xlu0 %v654_v25  ;;  %560 = vset.pattern.permute.xlu1 %v655_v26 }
 0x34d   :  { %278 = vperm.xlu0 %562, %v807_v22   ;;  %260 = vperm.xlu1 %560, %v807_v22  }
 0x351   :  { %563 = vset.pattern.permute.xlu0 %v656_v29  ;;  %566 = vset.pattern.permute.xlu1 %v657_v30 }
 0x352   :  { %284 = vperm.xlu0 %563, %v807_v22   ;;  %309 = vperm.xlu1 %566, %v807_v22  }
 0x356   :  { %564 = vset.pattern.permute.xlu0 %v658_v31  ;;  %569 = vset.pattern.permute.xlu1 %v659_v32 }
 0x357   :  { %291 = vperm.xlu0 %564, %v807_v22   ;;  %334 = vperm.xlu1 %569, %v807_v22  }
 0x35b   :  { %565 = vset.pattern.permute.xlu0 %v660_v33  ;;  %571 = vset.pattern.permute.xlu1 %v643_v27  ;;  %v663_v27 = vmov 11  }
 0x35c   :  { %303 = vperm.xlu0 %565, %v807_v22   ;;  %353 = vperm.xlu1 %571, %v807_v22  }
 0x360   :  { %567 = vset.pattern.permute.xlu0 %v661_v34  ;;  %572 = vset.pattern.permute.xlu1 %v648_v4 }
 0x361   :  { %316 = vperm.xlu0 %567, %v807_v22   ;;  %359 = vperm.xlu1 %572, %v807_v22  }
 0x365   :  { %568 = vset.pattern.permute.xlu0 %v662_v35  ;;  %574 = vset.pattern.permute.xlu1 %v644_v28  ;;  %v186_v28 = vpop.permute.xlu0 %185 }
 0x366   :  { %328 = vperm.xlu0 %568, %v807_v22   ;;  %378 = vperm.xlu1 %574, %v807_v22   ;;  %v188_v37 = vmul.f32 %v186_v28, %v767_v60 }
 0x368   :  { %v193_v39 = vadd.f32 %v787_v0, %v188_v37 }
 0x36a   :  { %570 = vset.pattern.permute.xlu0 %v663_v27  ;;  %575 = vset.pattern.permute.xlu1 %v646_v53  ;;  %v669_v53 = vmov 21  }
 0x36b   :  { %341 = vperm.xlu0 %570, %v807_v22   ;;  %384 = vperm.xlu1 %575, %v807_v22  }
 0x36f   :  { %573 = vset.pattern.permute.xlu0 %v650_v5  ;;  %577 = vset.pattern.permute.xlu1 %v664_v36 }
 0x370   :  { %366 = vperm.xlu0 %573, %v807_v22  }
 0x374   :  { %576 = vset.pattern.permute.xlu0 %v664_v36 }
 0x375   :  { %391 = vperm.xlu0 %576, %v807_v22  }
 0x3b6   :  { %v201_v38 = vpop.permute.xlu0 %200 }
 0x3b7   :  { %v203_v40 = vmul.f32 %v201_v38, %v782_v9 }
 0x3b9   :  { %v835_v41 = vadd.f32 %v203_v40, %v193_v39 }
 0x3bb   :  { %v221_v42 = vpop.permute.xlu0 %220 }
 0x3bc   :  { %v223_v16 = vmul.f32 %v221_v42, %v767_v60 }
 0x3be   :  { %v228_v23 = vadd.f32 %v790_v17, %v223_v16 }
 0x3bf   :  { %v172_v43 = vpop.permute.xlu0 %171 }
 0x3c0   :  { %v174_v44 = vmul.f32 %v172_v43, %v755_v45 }
 0x3c2   :  { %177 = vperm.xlu1 %577, %v174_v44   ;;  %v236_v55 = vpop.permute.xlu1 %235 }
 0x3c3   :  { %v242_v46 = vpop.permute.xlu0 %241  ;;  %v238_v19 = vmul.f32 %v236_v55, %v782_v9 }
 0x3c4   :  { %v244_v48 = vmul.f32 %v242_v46, %v755_v45  ;;  %v670_v45 = vmov 22  }
 0x3c6   :  { %247 = vperm.xlu0 %576, %v244_v48   ;;  %212 = vperm.xlu1 %577, %v209_v47  }
 0x3c7   :  { %v268_v54 = vpop.permute.xlu0 %267  ;;  %v255_v58 = vpop.permute.xlu1 %254 }
 0x3ca   :  { %580 = vset.pattern.permute.xlu0 %v665_v49  ;;  %578 = vset.pattern.permute.xlu1 %v666_v50 }
 0x3cb   :  { %416 = vperm.xlu0 %580, %v807_v22   ;;  %403 = vperm.xlu1 %578, %v807_v22  }
 0x3cc   :  { %v279_v57 = vpop.permute.xlu0 %278  ;;  %v261_v62 = vpop.permute.xlu1 %260 }
 0x3cf   :  { %583 = vset.pattern.permute.xlu0 %v667_v51  ;;  %579 = vset.pattern.permute.xlu1 %v668_v52 }
 0x3d0   :  { %441 = vperm.xlu0 %583, %v807_v22   ;;  %409 = vperm.xlu1 %579, %v807_v22  }
 0x3d1   :  { %v285_v61 = vpop.permute.xlu0 %284  ;;  %v310_v1 = vpop.permute.xlu1 %309 }
 0x3d4   :  { %581 = vset.pattern.permute.xlu1 %v669_v53 }
 0x3d5   :  { %428 = vperm.xlu1 %581, %v807_v22  }
 0x3d6   :  { %v292_v63 = vpop.permute.xlu0 %291  ;;  %v335_v3 = vpop.permute.xlu1 %334 }
 0x3d9   :  { %582 = vset.pattern.permute.xlu1 %v670_v45 }
 0x3da   :  { %434 = vperm.xlu1 %582, %v807_v22   ;;  %v239_v22 = vadd.f32 %v238_v19, %v228_v23 }
 0x3db   :  { %v304_v2 = vpop.permute.xlu0 %303  ;;  %v354_v5 = vpop.permute.xlu1 %353 }
 0x3e0   :  { %v317_v4 = vpop.permute.xlu0 %316  ;;  %v360_v7 = vpop.permute.xlu1 %359 }
 0x3e5   :  { %v329_v6 = vpop.permute.xlu0 %328  ;;  %v379_v10 = vpop.permute.xlu1 %378 }
 0x3ea   :  { %v342_v8 = vpop.permute.xlu0 %341  ;;  %v385_v14 = vpop.permute.xlu1 %384 }
 0x3ef   :  { %v367_v0 = vpop.permute.xlu0 %366 }
 0x3f4   :  { %v849_v15 = vpop.permute.xlu0 %391 }
 0x441   :  { %v178_v20 = vpop.permute.xlu1 %177 }
 0x442   :  { %v180_v21 = vmul.f32 %v178_v20, %v142_v18 }
 0x444   :  { %v855_v24 = vadd.f32 %v180_v21, %v785_v13 }
 0x445   :  { %v248_v11 = vpop.permute.xlu0 %247  ;;  %v213_v25 = vpop.permute.xlu1 %212 }
 0x446   :  { %v250_v26 = vmul.f32 %v248_v11, %v142_v18  ;;  %v215_v29 = vmul.f32 %v213_v25, %v142_v18  ;;  %v306_v60 = vsub.f32 %v855_v24, %v304_v2  ;;  %v257_v30 = vsub.f32 %v855_v24, %v255_v58 }
 0x447   :  { %v356_v59 = vsub.f32 %v855_v24, %v354_v5  ;;  %v281_v9 = vsub.f32 %v855_v24, %v279_v57  ;;  %v331_v31 = vsub.f32 %v855_v24, %v329_v6  ;;  %v381_v17 = vsub.f32 %v855_v24, %v379_v10 }
 0x448   :  { %v862_v32 = vadd.f32 %v250_v26, %v239_v22  ;;  %v865_v13 = vadd.f32 %v215_v29, %v835_v41  ;;  %v307_v33 = vmul.f32 %v306_v60, %v306_v60  ;;  %v258_v34 = vmul.f32 %v257_v30, %v257_v30 }
 0x449   :  { %v357_v35 = vmul.f32 %v356_v59, %v356_v59  ;;  %v282_v42 = vmul.f32 %v281_v9, %v281_v9  ;;  %v332_v43 = vmul.f32 %v331_v31, %v331_v31  ;;  %v382_v48 = vmul.f32 %v381_v17, %v381_v17 }
 0x44a   :  { %v417_v27 = vpop.permute.xlu0 %416  ;;  %v404_v36 = vpop.permute.xlu1 %403  ;;  %v312_v28 = vsub.f32 %v865_v13, %v310_v1  ;;  %v319_v37 = vsub.f32 %v862_v32, %v317_v4  ;;  %v263_v38 = vsub.f32 %v865_v13, %v261_v62  ;;  %v270_v39 = vsub.f32 %v862_v32, %v268_v54 }
 0x44b   :  { %v362_v40 = vsub.f32 %v865_v13, %v360_v7  ;;  %v369_v41 = vsub.f32 %v862_v32, %v367_v0  ;;  %v419_v44 = vsub.f32 %v862_v32, %v417_v27  ;;  %v406_v49 = vsub.f32 %v855_v24, %v404_v36 }
 0x44c   :  { %v313_v46 = vmul.f32 %v312_v28, %v312_v28  ;;  %v264_v47 = vmul.f32 %v263_v38, %v263_v38  ;;  %v320_v50 = vmul.f32 %v319_v37, %v319_v37  ;;  %v271_v51 = vmul.f32 %v270_v39, %v270_v39 }
 0x44d   :  { %v363_v52 = vmul.f32 %v362_v40, %v362_v40  ;;  %v287_v54 = vsub.f32 %v865_v13, %v285_v61  ;;  %v294_v55 = vsub.f32 %v862_v32, %v292_v63  ;;  %v370_v62 = vmul.f32 %v369_v41, %v369_v41 }
 0x44e   :  { %v314_v53 = vadd.f32 %v313_v46, %v307_v33  ;;  %v265_v45 = vadd.f32 %v264_v47, %v258_v34  ;;  %v337_v1 = vsub.f32 %v865_v13, %v335_v3  ;;  %v344_v2 = vsub.f32 %v862_v32, %v342_v8 }
 0x44f   :  { %v410_v57 = vpop.permute.xlu1 %409  ;;  %v364_v58 = vadd.f32 %v363_v52, %v357_v35  ;;  %v387_v7 = vsub.f32 %v865_v13, %v385_v14  ;;  %v407_v10 = vmul.f32 %v406_v49, %v406_v49  ;;  %v288_v0 = vmul.f32 %v287_v54, %v287_v54  ;;  %v442_v9 = vpop.permute.xlu0 %441 }
 0x450   :  { %v412_v4 = vsub.f32 %v865_v13, %v410_v57  ;;  %v321_v5 = vadd.f32 %v320_v50, %v314_v53  ;;  %v272_v6 = vadd.f32 %v271_v51, %v265_v45  ;;  %v338_v16 = vmul.f32 %v337_v1, %v337_v1 }
 0x451   :  { %v371_v12 = vadd.f32 %v370_v62, %v364_v58  ;;  %v295_v19 = vmul.f32 %v294_v55, %v294_v55  ;;  %v289_v3 = vadd.f32 %v288_v0, %v282_v42  ;;  %v345_v20 = vmul.f32 %v344_v2, %v344_v2 }
 0x452   :  { %v413_v61 = vmul.f32 %v412_v4, %v412_v4  ;;  %v323_v63 = vsel %vm273_vm4, %v321_v5, inf  ;;  %v274_v18 = vsel %vm273_vm4, %v272_v6, inf  ;;  %v339_v8 = vadd.f32 %v338_v16, %v332_v43 }
 0x453   :  { %324 = vmin.xlane.f32.xlu0 %v323_v63  ;;  %275 = vmin.xlane.f32.xlu1 %v274_v18  ;;  %v420_v21 = vmul.f32 %v419_v44, %v419_v44  ;;  %v388_v11 = vmul.f32 %v387_v7, %v387_v7  ;;  %v394_v14 = vsub.f32 %v862_v32, %v849_v15  ;;  %v373_v29 = vsel %vm273_vm4, %v371_v12, inf }
 0x454   :  { %v414_v23 = vadd.f32 %v413_v61, %v407_v10  ;;  %v429_v22 = vpop.permute.xlu1 %428  ;;  %v296_v25 = vadd.f32 %v295_v19, %v289_v3  ;;  %v346_v26 = vadd.f32 %v345_v20, %v339_v8  ;;  %v444_v15 = vsub.f32 %v862_v32, %v442_v9 }
 0x455   :  { %v389_v30 = vadd.f32 %v388_v11, %v382_v48  ;;  %v395_v59 = vmul.f32 %v394_v14, %v394_v14  ;;  %v431_v33 = vsub.f32 %v855_v24, %v429_v22  ;;  %v481_v22 = vstv %s68_s11 }
 0x456   :  { %v421_v60 = vadd.f32 %v420_v21, %v414_v23  ;;  %v297_v31 = vmin.f32 %v272_v6, %v296_v25  ;;  %v298_v17 = vsel %vm273_vm4, %v296_v25, inf  ;;  %v348_v38 = vsel %vm273_vm4, %v346_v26, inf }
 0x457   :  { %374 = vmin.xlane.f32.xlu0 %v373_v29  ;;  %299 = vmin.xlane.f32.xlu1 %v298_v17  ;;  %v396_v34 = vadd.f32 %v395_v59, %v389_v30  ;;  %v432_v39 = vmul.f32 %v431_v33, %v431_v33  ;;  %v445_v42 = vmul.f32 %v444_v15, %v444_v15  ;;  %v478_v11 = vstv %s52_s12 }
 0x458   :  { %v322_v27 = vmin.f32 %v297_v31, %v321_v5  ;;  %v423_v28 = vsel %vm273_vm4, %v421_v60, inf  ;;  %v482_v14 = vsel %vm480_vm6, %v481_v22, 0.0  ;;  %v479_v25 = vsel %vm477_vm7, %v478_v11, 0.0 }
 0x459   :  { %v435_v35 = vpop.permute.xlu1 %434  ;;  %v398_v44 = vsel %vm273_vm4, %v396_v34, inf }
 0x45a   :  { %v437_v36 = vsub.f32 %v865_v13, %v435_v35  ;;  %v347_v37 = vmin.f32 %v322_v27, %v346_v26  ;;  %v483_v26 = vadd.f32 %v482_v14, %v479_v25 }
 0x45b   :  { %424 = vmin.xlane.f32.xlu0 %v423_v28  ;;  %349 = vmin.xlane.f32.xlu1 %v348_v38 }
 0x45c   :  { %v438_v40 = vmul.f32 %v437_v36, %v437_v36  ;;  %v372_v41 = vmin.f32 %v347_v37, %v371_v12 }
 0x45e   :  { %v439_v24 = vadd.f32 %v438_v40, %v432_v39  ;;  %v397_v43 = vmin.f32 %v372_v41, %v396_v34 }
 0x45f   :  { %399 = vmin.xlane.f32.xlu1 %v398_v44 }
 0x460   :  { %v446_v46 = vadd.f32 %v445_v42, %v439_v24  ;;  %v422_v32 = vmin.f32 %v397_v43, %v421_v60 }
 0x462   :  { %v448_v13 = vsel %vm273_vm4, %v446_v46, inf  ;;  %v447_v47 = vmin.f32 %v422_v32, %v446_v46 }
 0x463   :  { %449 = vmin.xlane.f32.xlu1 %v448_v13 }
 0x464   :  { %v452_v48 = vsel %vm273_vm4, %v447_v47, 0.0 }
 0x465   :  { %453 = vadd.xlane.f32.xlu0 %v452_v48 }
 0x4e0   :  { %v276_v49 = vpop.xlane.xlu1 %275  ;;  %v325_v50 = vpop.xlane.xlu0 %324 }
 0x4e4   :  { %v300_v51 = vpop.xlane.xlu1 %299  ;;  %v375_v45 = vpop.xlane.xlu0 %374 }
 0x4e5   :  { %v301_v52 = vadd.f32 %v300_v51, %v276_v49 }
 0x4e7   :  { %v326_v53 = vadd.f32 %v325_v50, %v301_v52 }
 0x4e8   :  { %v350_v54 = vpop.xlane.xlu1 %349  ;;  %v425_v1 = vpop.xlane.xlu0 %424 }
 0x4e9   :  { %v351_v55 = vadd.f32 %v350_v54, %v326_v53 }
 0x4eb   :  { %v376_v57 = vadd.f32 %v375_v45, %v351_v55 }
 0x4ec   :  { %v400_v58 = vpop.xlane.xlu1 %399 }
 0x4ed   :  { %v401_v62 = vadd.f32 %v400_v58, %v376_v57 }
 0x4ef   :  { %v426_v2 = vadd.f32 %v425_v1, %v401_v62 }
 0x4f0   :  { %v450_v4 = vpop.xlane.xlu1 %449 }
 0x4f1   :  { %v451_v5 = vadd.f32 %v450_v4, %v426_v2 }
 0x4f2   :  { %v454_v6 = vpop.xlane.xlu0 %453 }
 0x4f3   :  { %v455_v7 = vrot.slane %v454_v6, 4  ;;  %v463_v10 = vsel %vm462_vm5, %v451_v5, 0.0 }
 0x4f4   :  { %464 = vadd.xlane.f32.xlu1 %v463_v10 }
 0x4f5   :  { %v456_v12 = vadd.f32 %v455_v7, %v454_v6 }
 0x4f7   :  { %v457_v0 = vrot.slane %v456_v12, 2 }
 0x4f9   :  { %v458_v16 = vadd.f32 %v457_v0, %v456_v12 }
 0x4fb   :  { %v459_v61 = vrot.slane %v458_v16, 1 }
 0x4fd   :  { %v460_v63 = vadd.f32 %v459_v61, %v458_v16 }
 0x4ff   :  { %508 = vpush %v460_v63 }
 0x530   :  { %s509_s13 = spop %508 }
 0x581   :  { %v465_v18 = vpop.xlane.xlu1 %464 }
 0x582   :  { %v466_v19 = vrot.slane %v465_v18, 4 }
 0x584   :  { %v467_v3 = vadd.f32 %v466_v19, %v465_v18 }
 0x586   :  { %v468_v8 = vrot.slane %v467_v3, 2 }
 0x588   :  { %v469_v20 = vadd.f32 %v468_v8, %v467_v3 }
 0x58a   :  { %v470_v21 = vrot.slane %v469_v20, 1 }
 0x58c   :  { %v471_v23 = vadd.f32 %v470_v21, %v469_v20 }
 0x58e   :  { %510 = vpush %v471_v23 }
 0x5bf   :  { %s511_s14 = spop %510 }
 0x5c0   :  { %s473_s15 = sadd.f32 %s511_s14, %s509_s13 }
 0x5c2   :  { %s476_s16 = smul.f32 0.0625, %s473_s15 }
 0x5c4   :  { %v485_v29 = vstv %s476_s16 }
 0x5c5   :  { %v486_v60 = vsel %vm484_vm8, %v485_v29, 0.0 }
 0x5c6   :  { %v487_v30 = vadd.f32 %v486_v60, %v483_v26 }
 0x5c8   :  { %488 = vst [vmem:[#allocation5] sm:$0x1] %v487_v30 }
 0x5c9   :  { %619 = shalt.err (!%p616_p12)
}
 0x5ca   :  { %s620_s23 = scalar_lea.hbm %s914_s3, 16 }
 0x5cb   :  { %p621_p13 = scmp.ne.s32.totalorder %s914_s3, %s620_s23  ;;  %p624_p0 = scmp.lt.u32.totalorder %s620_s23, %s914_s3 }
 0x5cd   :  { %p626_p1 = pnand %p624_p0, %p621_p13 }
 0x5cf   :  { %629 = shalt.err (!%p626_p1)
}
 0x5d0   :  { %498 = dma.vmem_to_hbm [thread:$0]  %s496_s18, 16, %s914_s3, [#allocation4]  }
 0x5d1   :  { %632 = dma.done.wait [#allocation4], 16  }
 0x5d2   :  { %633 = vsyncadd [#allocation4], 4294967280 }
 0x5d3   :  { %502 = vsyncpa [#allocation3], 1 }
 0x5d4   :  { %503 = vsyncpa [#allocation4], 1 }

</bundles_post_ra>
